<compile_context>
chip_gen: v5e
topology: v5e:2x2
jax: 0.10.0
libtpu: 0.0.40
codegen_flags: <defaults>
</compile_context>

<pallas_src>
import functools

import jax
import jax.numpy as jnp
from jax.experimental import pallas as pl
from jax.experimental.pallas import tpu as pltpu

LN_EPS = 1e-5   # nn.LayerNorm default
LANE = 128      # TPU lane width


def _round_up(n, m):
    return ((n + m - 1) // m) * m


def _cdiv(a, b):
    return (a + b - 1) // b


def _vmem_budget_bytes():
    """Generation-aware usable-VMEM budget (headroom for Mosaic scratch)."""
    try:
        cap = int(pltpu.get_tpu_info().vmem_capacity_bytes)
    except Exception:
        cap = 64 << 20  # conservative: v7x per-TC physical VMEM
    # ~87.5% of physical: ~112 MiB on v5e/v6e (128 MiB), ~56 MiB on v7x (64 MiB)
    return max(16 << 20, (cap // 8) * 7)


def _ln_relu(h, gamma, beta, hidden_real):
    """LayerNorm (f32 statistics, biased variance) + ReLU on an (tb, H_p) tile.

    Padded hidden columns of h are exactly 0 (zero-padded W1 cols / b1), so the
    sums over the padded width equal the sums over the real width; divide by
    the real hidden size. gamma/beta padding is 0, so padded columns stay 0.
    """
    inv_n = jnp.float32(1.0 / hidden_real)
    mean = jnp.sum(h, axis=-1, keepdims=True) * inv_n
    mean_sq = jnp.sum(h * h, axis=-1, keepdims=True) * inv_n
    var = jnp.maximum(mean_sq - mean * mean, 0.0)   # one-pass cancellation guard
    scale = jax.lax.rsqrt(var + LN_EPS) * gamma     # gamma folded into the scale
    hn = (h - mean) * scale + beta
    return jnp.maximum(hn, 0.0)


def _mlp_kernel_resident(x_ref, w1_ref, b1_ref, g_ref, beta_ref, w2_ref, b2_ref,
                         o_ref, *, hidden_real, op_dtype):
    """Both weight matrices VMEM-resident; one batch tile per grid step."""
    x = x_ref[...].astype(op_dtype)                       # in-kernel cast (VPU)
    h = jnp.dot(x, w1_ref[...], preferred_element_type=jnp.float32)
    h = h + b1_ref[...]
    hn = _ln_relu(h, g_ref[...], beta_ref[...], hidden_real)
    out = jnp.dot(hn.astype(op_dtype), w2_ref[...],
                  preferred_element_type=jnp.float32)
    o_ref[...] = (out + b2_ref[...]).astype(o_ref.dtype)


def _mlp_kernel_dout_tiled(x_ref, w1_ref, b1_ref, g_ref, beta_ref, w2_ref, b2_ref,
                           o_ref, h_scratch, *, hidden_real, op_dtype):
    """W2 streamed in D_out tiles; hidden computed once per batch tile (j==0)."""
    @pl.when(pl.program_id(1) == 0)
    def _():
        x = x_ref[...].astype(op_dtype)
        h = jnp.dot(x, w1_ref[...], preferred_element_type=jnp.float32)
        h = h + b1_ref[...]
        hn = _ln_relu(h, g_ref[...], beta_ref[...], hidden_real)
        h_scratch[...] = hn.astype(h_scratch.dtype)

    out = jnp.dot(h_scratch[...], w2_ref[...], preferred_element_type=jnp.float32)
    o_ref[...] = (out + b2_ref[...]).astype(o_ref.dtype)


def prepare_mlp_params(w1, b1, gamma, beta, w2, b2, *, matmul_dtype=None):
    """Pad/cast the parameters ONCE (hoisted out of the per-call forward path).

    w1: (D_in, H), w2: (H, D_out) stored as (in, out), i.e. the transpose of
    nn.Linear.weight. matmul_dtype=jnp.bfloat16 enables the native MXU operand
    path on v6e/v7x (f32 accumulation + f32 LayerNorm stats are kept either way;
    weight quantization error is baked in — use relaxed tolerances).
    """
    D_in, H = w1.shape
    H2, D_out = w2.shape
    assert H == H2, "w1/w2 hidden dims must match"
    if matmul_dtype is None:
        matmul_dtype = w1.dtype
    matmul_dtype = jnp.dtype(matmul_dtype)
    f32 = jnp.float32
    h_p = _round_up(H, LANE)
    d_out_p = _round_up(D_out, LANE)
    return dict(
        d_in=D_in, hidden=H, d_out=D_out, h_p=h_p, d_out_p=d_out_p,
        matmul_dtype=matmul_dtype,
        # D_in is intentionally NOT padded (smaller x DMA + fewer MXU K-rows).
        w1=jnp.pad(w1.astype(matmul_dtype), ((0, 0), (0, h_p - H))),
        w2=jnp.pad(w2.astype(matmul_dtype), ((0, h_p - H), (0, d_out_p - D_out))),
        b1=jnp.pad(b1.astype(f32), (0, h_p - H)).reshape(1, h_p),
        gamma=jnp.pad(gamma.astype(f32), (0, h_p - H)).reshape(1, h_p),
        beta=jnp.pad(beta.astype(f32), (0, h_p - H)).reshape(1, h_p),
        b2=jnp.pad(b2.astype(f32), (0, d_out_p - D_out)).reshape(1, d_out_p),
    )


def mlp_forward(x, params, *, tb=None, force_dout_tiling=False, dout_tile=256):
    """Fused MLP forward. x: (B, D_in); params from prepare_mlp_params()."""
    B, D_in = x.shape
    assert D_in == params["d_in"]
    H, h_p = params["hidden"], params["h_p"]
    d_out, d_out_p = params["d_out"], params["d_out_p"]
    op_dtype = params["matmul_dtype"]
    op_size = jnp.dtype(op_dtype).itemsize
    x_size = jnp.dtype(x.dtype).itemsize
    out_dtype = x.dtype

    budget = _vmem_budget_bytes()

    # Batch tile: fill the 256-wide MXU on v6e/v7x; keep >=2 tiles (megacore on
    # v7x) when B is large; shrink if the f32 hidden working set crowds VMEM.
    if tb is None:
        tb = min(256, _round_up(B, 8))
        if B >= 256 and _round_up(B, tb) // tb < 2:
            tb = _round_up(_cdiv(B, 2), 8)
        while tb > 64 and 3 * tb * h_p * 4 > budget // 4:
            tb = max(64, _round_up(tb // 2, 8))
    b_p = _round_up(B, tb)
    x_p = x if b_p == B else jnp.pad(x, ((0, b_p - B), (0, 0)))
    nb = b_p // tb

    # VMEM footprint bookkeeping.
    params_bytes = (3 * h_p + d_out_p) * 4
    w1_bytes = D_in * h_p * op_size
    w2_bytes = h_p * d_out_p * op_size
    working = 3 * tb * h_p * 4          # f32 hidden intermediates
    headroom = 4 << 20

    invariant = pl.BlockSpec(memory_space=pltpu.MemorySpace.VMEM)
    kernel_static = dict(hidden_real=float(H), op_dtype=op_dtype)

    resident_total = (w1_bytes + w2_bytes + params_bytes
                      + 2 * tb * (D_in + d_out_p) * x_size
                      + working + headroom)

    if not force_dout_tiling and resident_total <= budget:
        # ---- Fully weight-resident fused path (single-buffered weights). ----
        vmem_limit = int(min(max(resident_total, 16 << 20), budget))
        kernel = functools.partial(_mlp_kernel_resident, **kernel_static)
        out_p = pl.pallas_call(
            kernel,
            out_shape=jax.ShapeDtypeStruct((b_p, d_out_p), out_dtype),
            grid_spec=pltpu.PrefetchScalarGridSpec(
                num_scalar_prefetch=0,
                grid=(nb,),
                in_specs=[
                    pl.BlockSpec((tb, D_in), lambda i: (i, 0)),  # x tile (pipelined)
                    invariant,   # W1
                    invariant,   # b1
                    invariant,   # gamma
                    invariant,   # beta
                    invariant,   # W2
                    invariant,   # b2
                ],
                out_specs=pl.BlockSpec((tb, d_out_p), lambda i: (i, 0)),
            ),
            compiler_params=pltpu.CompilerParams(
                dimension_semantics=("parallel",),
                vmem_limit_bytes=vmem_limit),
        )(x_p, params["w1"], params["b1"], params["gamma"], params["beta"],
          params["w2"], params["b2"])
    else:
        # ---- D_out-tiled fallback (W2 streamed; hidden reused via scratch). ----
        tn = min(_round_up(dout_tile, LANE), d_out_p)
        nj = d_out_p // tn
        tiled_total = (w1_bytes + params_bytes
                       + 2 * tb * D_in * x_size
                       + 2 * h_p * tn * op_size       # W2 tiles (double-buffered)
                       + 2 * tb * tn * x_size         # out tiles
                       + tb * h_p * op_size           # hidden scratch
                       + working + headroom)
        vmem_limit = int(min(max(tiled_total, 16 << 20), budget))
        # TODO(synk): if W1 itself (D_in*h_p) exceeds the VMEM budget, add a
        # third "arbitrary" grid axis tiling D_in with an f32 hidden accumulator.
        kernel = functools.partial(_mlp_kernel_dout_tiled, **kernel_static)
        out_p = pl.pallas_call(
            kernel,
            out_shape=jax.ShapeDtypeStruct((b_p, d_out_p), out_dtype),
            grid_spec=pltpu.PrefetchScalarGridSpec(
                num_scalar_prefetch=0,
                grid=(nb, nj),
                in_specs=[
                    pl.BlockSpec((tb, D_in), lambda i, j: (i, 0)),   # x tile
                    invariant,                                       # W1
                    invariant, invariant, invariant,                 # b1, gamma, beta
                    pl.BlockSpec((h_p, tn), lambda i, j: (0, j)),    # W2 tile
                    pl.BlockSpec((1, tn), lambda i, j: (0, j)),      # b2 tile
                ],
                out_specs=pl.BlockSpec((tb, tn), lambda i, j: (i, j)),
                scratch_shapes=[pltpu.VMEM((tb, h_p), op_dtype)],
            ),
            compiler_params=pltpu.CompilerParams(
                dimension_semantics=("parallel", "arbitrary"),
                vmem_limit_bytes=vmem_limit),
        )(x_p, params["w1"], params["b1"], params["gamma"], params["beta"],
          params["w2"], params["b2"])

    return out_p[:B, :d_out]


def reference_mlp(x, w1, b1, gamma, beta, w2, b2):
    h = x @ w1 + b1
    mean = jnp.mean(h, axis=-1, keepdims=True)
    var = jnp.mean((h - mean) ** 2, axis=-1, keepdims=True)
    hn = (h - mean) / jnp.sqrt(var + LN_EPS) * gamma + beta
    hn = jnp.maximum(hn, 0.0)
    return hn @ w2 + b2


if __name__ == "__main__":
    # Small shapes consistent with the module's forward.
    B, D_in, H, D_out = 16, 32, 64, 16

    key = jax.random.PRNGKey(0)
    kx, kw1, kb1, kw2, kb2 = jax.random.split(key, 5)

    x = jax.random.normal(kx, (B, D_in), dtype=jnp.float32)

    # Deterministic parameter init (stands in for the module's weight_init).
    w1 = jax.random.normal(kw1, (D_in, H), dtype=jnp.float32) * 0.05
    b1 = jax.random.normal(kb1, (H,), dtype=jnp.float32) * 0.01
    gamma = jnp.ones((H,), dtype=jnp.float32)      # LayerNorm weight init
    beta = jnp.zeros((H,), dtype=jnp.float32)      # LayerNorm bias init
    w2 = jax.random.normal(kw2, (H, D_out), dtype=jnp.float32) * 0.05
    b2 = jax.random.normal(kb2, (D_out,), dtype=jnp.float32) * 0.01

    ref = reference_mlp(x, w1, b1, gamma, beta, w2, b2)

    # 1) Exact f32 path; parameters are padded/cast ONCE and reused.
    params_f32 = prepare_mlp_params(w1, b1, gamma, beta, w2, b2)
    out = jax.block_until_ready(mlp_forward(x, params_f32))
    assert out.shape == (B, D_out)
    assert jnp.allclose(out, ref, atol=1e-4, rtol=1e-4), "f32 mismatch vs reference"

    # 2) bf16-operand mode for f32 inputs (native MXU path on v6e/v7x),
    #    f32 accumulation + f32 LayerNorm statistics.
    params_bf16 = prepare_mlp_params(w1, b1, gamma, beta, w2, b2,
                                     matmul_dtype=jnp.bfloat16)
    out_bf16 = jax.block_until_ready(mlp_forward(x, params_bf16))
    assert jnp.allclose(out_bf16, ref, atol=5e-2, rtol=5e-2), \
        "bf16-operand mismatch vs reference"

    # 3) bf16 activations end-to-end.
    out_act_bf16 = jax.block_until_ready(
        mlp_forward(x.astype(jnp.bfloat16), params_bf16))
    assert out_act_bf16.shape == (B, D_out)
    assert jnp.allclose(out_act_bf16.astype(jnp.float32), ref,
                        atol=5e-2, rtol=5e-2), "bf16 activation mismatch"

    # 4) D_out-tiled fallback path (used when W2 can't stay VMEM-resident,
    #    e.g. on v7x's 64 MiB/TC); forced here at a small shape to validate it.
    D_out_big = 256
    w2b = jax.random.normal(kw2, (H, D_out_big), dtype=jnp.float32) * 0.05
    b2b = jax.random.normal(kb2, (D_out_big,), dtype=jnp.float32) * 0.01
    refb = reference_mlp(x, w1, b1, gamma, beta, w2b, b2b)
    params_big = prepare_mlp_params(w1, b1, gamma, beta, w2b, b2b)
    out_tiled = jax.block_until_ready(
        mlp_forward(x, params_big, force_dout_tiling=True, dout_tile=128))
    assert out_tiled.shape == (B, D_out_big)
    assert jnp.allclose(out_tiled, refb, atol=1e-4, rtol=1e-4), \
        "D_out-tiled path mismatch vs reference"

    print("KERNEL_OK")
</pallas_src>

<mosaic_0001>
module attributes {stable_mosaic.version = 11 : i64} {
  func.func @_mlp_kernel_resident(%arg0: i32, %arg1: memref<16x32xf32, #tpu.memory_space<vmem>>, %arg2: memref<32x128xf32, #tpu.memory_space<vmem>>, %arg3: memref<1x128xf32, #tpu.memory_space<vmem>>, %arg4: memref<1x128xf32, #tpu.memory_space<vmem>>, %arg5: memref<1x128xf32, #tpu.memory_space<vmem>>, %arg6: memref<128x128xf32, #tpu.memory_space<vmem>>, %arg7: memref<1x128xf32, #tpu.memory_space<vmem>>, %arg8: memref<16x128xf32, #tpu.memory_space<vmem>>) attributes {dimension_semantics = [#tpu.dimension_semantics<parallel>], iteration_bounds = array<i64: 1>, scalar_prefetch = 0 : i64, scratch_operands = 0 : i64, tpu.core_type = #tpu.core_type<tc>, window_params = [{transform_indices = @transform_0, window_bounds = array<i64: 16, 32>}, {pipeline_mode = #tpu.pipeline_mode<synchronous>, transform_indices = @transform_1, window_bounds = array<i64: 32, 128>}, {pipeline_mode = #tpu.pipeline_mode<synchronous>, transform_indices = @transform_2, window_bounds = array<i64: 1, 128>}, {pipeline_mode = #tpu.pipeline_mode<synchronous>, transform_indices = @transform_3, window_bounds = array<i64: 1, 128>}, {pipeline_mode = #tpu.pipeline_mode<synchronous>, transform_indices = @transform_4, window_bounds = array<i64: 1, 128>}, {pipeline_mode = #tpu.pipeline_mode<synchronous>, transform_indices = @transform_5, window_bounds = array<i64: 128, 128>}, {pipeline_mode = #tpu.pipeline_mode<synchronous>, transform_indices = @transform_6, window_bounds = array<i64: 1, 128>}, {transform_indices = @transform_7, window_bounds = array<i64: 16, 128>}]} {
    %c0 = arith.constant 0 : index
    %c0_0 = arith.constant 0 : index
    %0 = vector.load %arg1[%c0, %c0_0] : memref<16x32xf32, #tpu.memory_space<vmem>>, vector<16x32xf32>
    %c0_1 = arith.constant 0 : index
    %c0_2 = arith.constant 0 : index
    %1 = vector.load %arg2[%c0_1, %c0_2] : memref<32x128xf32, #tpu.memory_space<vmem>>, vector<32x128xf32>
    %cst = arith.constant dense<0.000000e+00> : vector<16x128xf32>
    %2 = tpu.matmul %0, %1, %cst {dimension_numbers = #tpu.dot_dimension_numbers<[1], [0], [0], [1], [0, 0, 1, 1], [], []>} : vector<16x32xf32>, vector<32x128xf32>, vector<16x128xf32> -> vector<16x128xf32>
    %c0_3 = arith.constant 0 : index
    %c0_4 = arith.constant 0 : index
    %3 = vector.load %arg3[%c0_3, %c0_4] : memref<1x128xf32, #tpu.memory_space<vmem>>, vector<1x128xf32>
    %4 = vector.broadcast %3 : vector<1x128xf32> to vector<16x128xf32>
    %5 = arith.addf %2, %4 : vector<16x128xf32>
    %c0_5 = arith.constant 0 : index
    %c0_6 = arith.constant 0 : index
    %6 = vector.load %arg4[%c0_5, %c0_6] : memref<1x128xf32, #tpu.memory_space<vmem>>, vector<1x128xf32>
    %c0_7 = arith.constant 0 : index
    %c0_8 = arith.constant 0 : index
    %7 = vector.load %arg5[%c0_7, %c0_8] : memref<1x128xf32, #tpu.memory_space<vmem>>, vector<1x128xf32>
    %cst_9 = arith.constant dense<0.000000e+00> : vector<16xf32>
    %8 = vector.multi_reduction <add>, %5, %cst_9 [1] : vector<16x128xf32> to vector<16xf32>
    %9 = vector.shape_cast %8 : vector<16xf32> to vector<16x1xf32>
    %cst_10 = arith.constant 1.562500e-02 : f32
    %10 = vector.broadcast %cst_10 : f32 to vector<16x1xf32>
    %11 = arith.mulf %9, %10 : vector<16x1xf32>
    %12 = arith.mulf %5, %5 : vector<16x128xf32>
    %cst_11 = arith.constant dense<0.000000e+00> : vector<16xf32>
    %13 = vector.multi_reduction <add>, %12, %cst_11 [1] : vector<16x128xf32> to vector<16xf32>
    %14 = vector.shape_cast %13 : vector<16xf32> to vector<16x1xf32>
    %cst_12 = arith.constant 1.562500e-02 : f32
    %15 = vector.broadcast %cst_12 : f32 to vector<16x1xf32>
    %16 = arith.mulf %14, %15 : vector<16x1xf32>
    %17 = arith.mulf %11, %11 : vector<16x1xf32>
    %18 = arith.subf %16, %17 : vector<16x1xf32>
    %cst_13 = arith.constant 0.000000e+00 : f32
    %19 = vector.broadcast %cst_13 : f32 to vector<16x1xf32>
    %20 = arith.maximumf %18, %19 : vector<16x1xf32>
    %cst_14 = arith.constant 9.99999974E-6 : f32
    %21 = vector.broadcast %cst_14 : f32 to vector<16x1xf32>
    %22 = arith.addf %20, %21 : vector<16x1xf32>
    %23 = math.rsqrt %22 : vector<16x1xf32>
    %24 = vector.broadcast %23 : vector<16x1xf32> to vector<16x128xf32>
    %25 = vector.broadcast %6 : vector<1x128xf32> to vector<16x128xf32>
    %26 = arith.mulf %24, %25 : vector<16x128xf32>
    %27 = vector.broadcast %11 : vector<16x1xf32> to vector<16x128xf32>
    %28 = arith.subf %5, %27 : vector<16x128xf32>
    %29 = arith.mulf %28, %26 : vector<16x128xf32>
    %30 = vector.broadcast %7 : vector<1x128xf32> to vector<16x128xf32>
    %31 = arith.addf %29, %30 : vector<16x128xf32>
    %cst_15 = arith.constant 0.000000e+00 : f32
    %32 = vector.broadcast %cst_15 : f32 to vector<16x128xf32>
    %33 = arith.maximumf %31, %32 : vector<16x128xf32>
    %c0_16 = arith.constant 0 : index
    %c0_17 = arith.constant 0 : index
    %34 = vector.load %arg6[%c0_16, %c0_17] : memref<128x128xf32, #tpu.memory_space<vmem>>, vector<128x128xf32>
    %cst_18 = arith.constant dense<0.000000e+00> : vector<16x128xf32>
    %35 = tpu.matmul %33, %34, %cst_18 {dimension_numbers = #tpu.dot_dimension_numbers<[1], [0], [0], [1], [0, 0, 1, 1], [], []>} : vector<16x128xf32>, vector<128x128xf32>, vector<16x128xf32> -> vector<16x128xf32>
    %c0_19 = arith.constant 0 : index
    %c0_20 = arith.constant 0 : index
    %36 = vector.load %arg7[%c0_19, %c0_20] : memref<1x128xf32, #tpu.memory_space<vmem>>, vector<1x128xf32>
    %37 = vector.broadcast %36 : vector<1x128xf32> to vector<16x128xf32>
    %38 = arith.addf %35, %37 : vector<16x128xf32>
    %c0_21 = arith.constant 0 : index
    %c0_22 = arith.constant 0 : index
    %39 = vector.load %arg8[%c0_21, %c0_22] : memref<16x128xf32, #tpu.memory_space<vmem>>, vector<16x128xf32>
    tpu.vector_store %arg8[%c0_21, %c0_22], %38 {strides = array<i32>} : memref<16x128xf32, #tpu.memory_space<vmem>>, vector<16x128xf32>,
    return
  }
  func.func @transform_0(%arg0: i32) -> (i32, i32) {
    %c0_i32 = arith.constant 0 : i32
    %c0_i32_0 = arith.constant 0 : i32
    return %arg0, %c0_i32 : i32, i32
  }
  func.func @transform_1(%arg0: i32) -> (i32, i32) {
    %c0_i32 = arith.constant 0 : i32
    %c0_i32_0 = arith.constant 0 : i32
    %c0_i32_1 = arith.constant 0 : i32
    return %c0_i32, %c0_i32_0 : i32, i32
  }
  func.func @transform_2(%arg0: i32) -> (i32, i32) {
    %c0_i32 = arith.constant 0 : i32
    %c0_i32_0 = arith.constant 0 : i32
    %c0_i32_1 = arith.constant 0 : i32
    return %c0_i32, %c0_i32_0 : i32, i32
  }
  func.func @transform_3(%arg0: i32) -> (i32, i32) {
    %c0_i32 = arith.constant 0 : i32
    %c0_i32_0 = arith.constant 0 : i32
    %c0_i32_1 = arith.constant 0 : i32
    return %c0_i32, %c0_i32_0 : i32, i32
  }
  func.func @transform_4(%arg0: i32) -> (i32, i32) {
    %c0_i32 = arith.constant 0 : i32
    %c0_i32_0 = arith.constant 0 : i32
    %c0_i32_1 = arith.constant 0 : i32
    return %c0_i32, %c0_i32_0 : i32, i32
  }
  func.func @transform_5(%arg0: i32) -> (i32, i32) {
    %c0_i32 = arith.constant 0 : i32
    %c0_i32_0 = arith.constant 0 : i32
    %c0_i32_1 = arith.constant 0 : i32
    return %c0_i32, %c0_i32_0 : i32, i32
  }
  func.func @transform_6(%arg0: i32) -> (i32, i32) {
    %c0_i32 = arith.constant 0 : i32
    %c0_i32_0 = arith.constant 0 : i32
    %c0_i32_1 = arith.constant 0 : i32
    return %c0_i32, %c0_i32_0 : i32, i32
  }
  func.func @transform_7(%arg0: i32) -> (i32, i32) {
    %c0_i32 = arith.constant 0 : i32
    %c0_i32_0 = arith.constant 0 : i32
    return %arg0, %c0_i32 : i32, i32
  }
}

</mosaic_0001>

<bundles_post_ra>
// kernel: tpu_custom_call.1
= control target key start
LH: loop header
LB: loop body
LE: loop exit
PB: predicated region body
PF: predicated region fallthrough
CT: control target
= control target key end

     0   :  { %12 = vsyncpa [#allocation3], 0  ;;  %s467_s0 = inlined_call_operand.hbm [shape: f32[16,32], index: 0, kind: input, shape index: {}]   ;;  %s468_s1 = inlined_call_operand.hbm [shape: f32[32,128], index: 1, kind: input, shape index: {}]   ;;  %s469_s2 = inlined_call_operand.vmem [shape: f32[1,128], index: 2, kind: input, shape index: {}]   ;;  %s470_s3 = inlined_call_operand.vmem [shape: f32[1,128], index: 3, kind: input, shape index: {}]   ;;  %s471_s4 = inlined_call_operand.vmem [shape: f32[1,128], index: 4, kind: input, shape index: {}]   ;;  %s472_s5 = inlined_call_operand.hbm [shape: f32[128,128], index: 5, kind: input, shape index: {}]   ;;  %s473_s6 = inlined_call_operand.vmem [shape: f32[1,128], index: 6, kind: input, shape index: {}]   ;;  %s474_s7 = inlined_call_operand.hbm [shape: f32[16,128], index: 7, kind: output, shape index: {}]  }
   0x1   :  { %13 = vsyncpa [#allocation6], 0 }
   0x2   :  { %14 = vsyncpa [#allocation4], 0  ;;  %s32_s26 = sshll.u32 %s468_s1, 4  ;;  %s373_s27 = smov [#allocation5]   ;;  %s33_s26 = int_to_ptr.hbm [resolvable:$true] %s32_s26 }
   0x3   :  { %s34_s28 = sshll.u32 %s373_s27, 4  ;;  %s19_s8 = sshll.u32 %s467_s0, 4  ;;  %s35_s28 = int_to_ptr.vmem [resolvable:$true] %s34_s28  ;;  %s20_s8 = int_to_ptr.hbm [resolvable:$true] %s19_s8 }
   0x4   :  { %s374_s9 = smov 128   ;;  %s375_s10 = smov 8  }
   0x5   :  { %40 = dma.hbm_to_vmem [thread:$0]  %s33_s26, 512, %s35_s28, [#allocation6], %s374_s9, %s374_s9, %s375_s10  }
   0x6   :  { %s376_s11 = smov [#allocation2]   ;;  %s51_s1 = sshll.u32 %s472_s5, 4  ;;  %s52_s1 = int_to_ptr.hbm [resolvable:$true] %s51_s1 }
   0x7   :  { %s21_s12 = sshll.u32 %s376_s11, 4  ;;  %s377_s0 = smov [#allocation7]   ;;  %s22_s12 = int_to_ptr.vmem [resolvable:$true] %s21_s12 }
   0x8   :  { %27 = dma.hbm_to_vmem [thread:$0]  %s20_s8, 256, %s22_s12, [#allocation3], %s374_s9, %s374_s9, %s375_s10  }
   0x9   :  { %s53_s15 = sshll.u32 %s377_s0, 4  ;;  %s54_s15 = int_to_ptr.vmem [resolvable:$true] %s53_s15 }
   0xa   :  { %59 = dma.hbm_to_vmem [thread:$0]  %s52_s1, 2048, %s54_s15, [#allocation6], %s374_s9, %s374_s9, %s375_s10  }
   0xb   :  { %367 = dma.done.wait [#allocation3], 256  }
   0xc   :  { %368 = vsyncadd [#allocation3], 4294967040 }
   0xd   :  { %369 = dma.done.wait [#allocation6], 2560  }
   0xe   :  { %370 = vsyncadd [#allocation6], 4294964736  ;;  %v79_v0 = vld [vmem:[#allocation5 + $0x18] sm:$0xff]  ;;  %v78_v1 = vld [vmem:[#allocation5 + $0x10] sm:$0xff]  ;;  %vm84_vm0 = vcmask 261120   ;;  %s378_s20 = smov [#allocation8]  }
   0xf   :  { %103 = vmatpush.msra.mxu0 %v79_v0  ;;  %v77_v2 = vld [vmem:[#allocation5 + $0x8] sm:$0xff]  ;;  %v76_v3 = vld [vmem:[#allocation5] sm:$0xff]  ;;  %v74_v4 = vld [vmem:[#allocation2] sm:$0xff]  ;;  %s223_s21 = sshll.u32 %s378_s20, 4  ;;  %s225_s24 = sshll.u32 %s474_s7, 4  ;;  %s224_s21 = int_to_ptr.vmem [resolvable:$true] %s223_s21  ;;  %s226_s24 = int_to_ptr.hbm [resolvable:$true] %s225_s24 }
  0x10   :  { %v75_v5 = vld [vmem:[#allocation2 + $0x8] sm:$0xff]  ;;  %v263_v6 = vld [vmem:[%s469_s2] ss:$0 sm:$0xff]  ;;  %v187_v15 = vld [vmem:[#allocation7 + $0x68] sm:$0xff] }
  0x11   :  { %104 = vmatpush.msra.mxu0 %v78_v1  ;;  %v189_v13 = vld [vmem:[#allocation7 + $0x78] sm:$0xff]  ;;  %v188_v14 = vld [vmem:[#allocation7 + $0x70] sm:$0xff]  ;;  %v186_v16 = vld [vmem:[#allocation7 + $0x60] sm:$0xff] }
  0x12   :  { %194 = vmatpush.msra.mxu1 %v189_v13  ;;  %241 = vmatpush.msra.mxu2 %v189_v13  ;;  %v185_v17 = vld [vmem:[#allocation7 + $0x58] sm:$0xff]  ;;  %v184_v18 = vld [vmem:[#allocation7 + $0x50] sm:$0xff]  ;;  %v183_v19 = vld [vmem:[#allocation7 + $0x48] sm:$0xff] }
  0x13   :  { %105 = vmatpush.msra.mxu0 %v77_v2  ;;  %v182_v20 = vld [vmem:[#allocation7 + $0x40] sm:$0xff]  ;;  %v181_v21 = vld [vmem:[#allocation7 + $0x38] sm:$0xff]  ;;  %v180_v22 = vld [vmem:[#allocation7 + $0x30] sm:$0xff] }
  0x14   :  { %195 = vmatpush.msra.mxu1 %v188_v14  ;;  %242 = vmatpush.msra.mxu2 %v188_v14  ;;  %v179_v23 = vld [vmem:[#allocation7 + $0x28] sm:$0xff]  ;;  %v178_v25 = vld [vmem:[#allocation7 + $0x20] sm:$0xff]  ;;  %v177_v26 = vld [vmem:[#allocation7 + $0x18] sm:$0xff] }
  0x15   :  { %106 = vmatpush.msra.mxu0 %v76_v3  ;;  %v176_v28 = vld [vmem:[#allocation7 + $0x10] sm:$0xff]  ;;  %v175_v29 = vld [vmem:[#allocation7 + $0x8] sm:$0xff]  ;;  %v174_v30 = vld [vmem:[#allocation7] sm:$0xff] }
  0x16   :  { %239 = vmatmul.msk.f32.vlgmr.msra.gmra.mxu0 %vm84_vm0, %v74_v4  ;;  %196 = vmatpush.msra.mxu1 %v187_v15  ;;  %v264_v51 = vld [vmem:[%s470_s3] ss:$0 sm:$0xff] }
  0x17   :  { %243 = vmatpush.msra.mxu2 %v187_v15  ;;  %v265_v58 = vld [vmem:[%s471_s4] ss:$0 sm:$0xff] }
  0x18   :  { %197 = vmatpush.msra.mxu1 %v186_v16 }
  0x19   :  { %244 = vmatpush.msra.mxu2 %v186_v16 }
  0x1a   :  { %198 = vmatpush.msra.mxu1 %v185_v17 }
  0x1b   :  { %245 = vmatpush.msra.mxu2 %v185_v17 }
  0x1c   :  { %199 = vmatpush.msra.mxu1 %v184_v18 }
  0x1d   :  { %246 = vmatpush.msra.mxu2 %v184_v18 }
  0x1e   :  { %240 = vmatmul.msk.f32.gmra.mxu0 %vm84_vm0, %v75_v5  ;;  %200 = vmatpush.msra.mxu1 %v183_v19 }
  0x1f   :  { %247 = vmatpush.msra.mxu2 %v183_v19 }
  0x20   :  { %201 = vmatpush.msra.mxu1 %v182_v20 }
  0x21   :  { %248 = vmatpush.msra.mxu2 %v182_v20 }
  0x22   :  { %202 = vmatpush.msra.mxu1 %v181_v21 }
  0x23   :  { %249 = vmatpush.msra.mxu2 %v181_v21 }
  0x24   :  { %203 = vmatpush.msra.mxu1 %v180_v22 }
  0x25   :  { %250 = vmatpush.msra.mxu2 %v180_v22 }
  0x26   :  { %204 = vmatpush.msra.mxu1 %v179_v23 }
  0x27   :  { %251 = vmatpush.msra.mxu2 %v179_v23 }
  0x28   :  { %205 = vmatpush.msra.mxu1 %v178_v25 }
  0x29   :  { %252 = vmatpush.msra.mxu2 %v178_v25 }
  0x2a   :  { %206 = vmatpush.msra.mxu1 %v177_v26 }
  0x2b   :  { %253 = vmatpush.msra.mxu2 %v177_v26 }
  0x2c   :  { %207 = vmatpush.msra.mxu1 %v176_v28 }
  0x2d   :  { %254 = vmatpush.msra.mxu2 %v176_v28 }
  0x2e   :  { %208 = vmatpush.msra.mxu1 %v175_v29 }
  0x2f   :  { %255 = vmatpush.msra.mxu2 %v175_v29 }
  0x30   :  { %209 = vmatpush.msra.mxu1 %v174_v30 }
  0x31   :  { %256 = vmatpush.msra.mxu2 %v174_v30 }
  0x93   :  { %v108_v7 = vpop.f32.mrf.mxu0 }
  0x94   :  { %v440_v8 = vadd.f32 %v263_v6, %v108_v7  ;;  %v266_v7 = vld [vmem:[%s473_s6] ss:$0 sm:$0xff] }
  0x96   :  { %116 = vadd.xlane.f32.xlu1 %v440_v8  ;;  %v122_v11 = vmul.f32 %v440_v8, %v440_v8 }
  0x9b   :  { %v111_v9 = vpop.f32.mrf.mxu0 }
  0x9c   :  { %v443_v10 = vadd.f32 %v263_v6, %v111_v9 }
  0x9e   :  { %118 = vadd.xlane.f32.xlu0 %v443_v10  ;;  %124 = vadd.xlane.f32.xlu1 %v122_v11  ;;  %v123_v12 = vmul.f32 %v443_v10, %v443_v10 }
  0xa6   :  { %126 = vadd.xlane.f32.xlu0 %v123_v12 }
 0x109   :  { %v117_v24 = vpop.xlane.xlu1 %116 }
 0x10a   :  { %v120_v27 = vmul.f32 0.015625, %v117_v24 }
 0x10c   :  { %v130_v33 = vmul.f32 %v120_v27, %v120_v27  ;;  %v163_v56 = vsub.f32 %v440_v8, %v120_v27 }
 0x111   :  { %v119_v31 = vpop.xlane.xlu0 %118  ;;  %v125_v32 = vpop.xlane.xlu1 %124 }
 0x112   :  { %v128_v34 = vmul.f32 0.015625, %v125_v32  ;;  %v121_v36 = vmul.f32 0.015625, %v119_v31 }
 0x114   :  { %v132_v35 = vsub.f32 %v128_v34, %v130_v33  ;;  %v131_v40 = vmul.f32 %v121_v36, %v121_v36  ;;  %v164_v2 = vsub.f32 %v443_v10, %v121_v36 }
 0x116   :  { %v134_v37 = vmax.f32 %v132_v35, 0.0 }
 0x118   :  { %v136_v38 = vadd.f32 1e-05, %v134_v37 }
 0x119   :  { %v127_v39 = vpop.xlane.xlu0 %126 }
 0x11a   :  { %267 = vrsqrt.f32 %v136_v38  ;;  %v129_v41 = vmul.f32 0.015625, %v127_v39  ;;  %vm144_vm2 = vweird.f32 %v136_v38 }
 0x11c   :  { %v133_v42 = vsub.f32 %v129_v41, %v131_v40 }
 0x11e   :  { %v135_v43 = vmax.f32 %v133_v42, 0.0 }
 0x120   :  { %v268_v44 = vpop.eup %267  ;;  %v137_v45 = vadd.f32 1e-05, %v135_v43 }
 0x121   :  { %v139_v46 = vmul.f32 %v268_v44, %v136_v38  ;;  %vm145_vm1 = vweird.f32 %v268_v44 }
 0x122   :  { %269 = vrsqrt.f32 %v137_v45  ;;  %vm146_vm3 = vmor %vm144_vm2, %vm145_vm1  ;;  %vm154_vm5 = vweird.f32 %v137_v45 }
 0x123   :  { %v140_v47 = vmul.f32 %v268_v44, %v139_v46 }
 0x125   :  { %v141_v48 = vmul.f32 0.5, %v140_v47 }
 0x127   :  { %v142_v49 = vsub.f32 1.5, %v141_v48 }
 0x128   :  { %v270_v50 = vpop.eup %269 }
 0x129   :  { %v149_v52 = vmul.f32 %v270_v50, %v137_v45  ;;  %v143_v53 = vmul.f32 %v268_v44, %v142_v49  ;;  %vm155_vm4 = vweird.f32 %v270_v50 }
 0x12a   :  { %vm156_vm6 = vmor %vm154_vm5, %vm155_vm4 }
 0x12b   :  { %v150_v54 = vmul.f32 %v270_v50, %v149_v52  ;;  %v147_v55 = vsel %vm146_vm3, %v268_v44, %v143_v53 }
 0x12c   :  { %v161_v57 = vmul.f32 %v264_v51, %v147_v55 }
 0x12d   :  { %v151_v59 = vmul.f32 0.5, %v150_v54 }
 0x12e   :  { %v165_v60 = vmul.f32 %v163_v56, %v161_v57 }
 0x12f   :  { %v152_v61 = vsub.f32 1.5, %v151_v59 }
 0x130   :  { %v170_v62 = vadd.f32 %v265_v58, %v165_v60 }
 0x131   :  { %v153_v63 = vmul.f32 %v270_v50, %v152_v61 }
 0x132   :  { %v172_v0 = vmax.f32 %v170_v62, 0.0 }
 0x133   :  { %v157_v1 = vsel %vm156_vm6, %v270_v50, %v153_v63 }
 0x134   :  { %210 = vmatmul.f32.vlgmr.msra.gmra.mxu1 %v172_v0  ;;  %v162_v3 = vmul.f32 %v264_v51, %v157_v1 }
 0x136   :  { %v166_v4 = vmul.f32 %v164_v2, %v162_v3 }
 0x138   :  { %v171_v5 = vadd.f32 %v265_v58, %v166_v4 }
 0x13a   :  { %v173_v6 = vmax.f32 %v171_v5, 0.0 }
 0x13c   :  { %213 = vmatmul.f32.vlgmr.msra.gmra.mxu2 %v173_v6 }
 0x1b1   :  { %v211_v8 = vpop.f32.mrf.mxu1 }
 0x1b2   :  { %v212_v9 = vadd.f32 %v266_v7, %v211_v8 }
 0x1b4   :  { %217 = vst [vmem:[#allocation8] sm:$0xff] %v212_v9 }
 0x1bf   :  { %v214_v10 = vpop.f32.mrf.mxu2 }
 0x1c0   :  { %v215_v11 = vadd.f32 %v266_v7, %v214_v10 }
 0x1c2   :  { %218 = vst [vmem:[#allocation8 + $0x8] sm:$0xff] %v215_v11 }
 0x1c3   :  { %231 = dma.vmem_to_hbm [thread:$0]  %s224_s21, 256, %s226_s24, [#allocation4], %s374_s9, %s374_s9, %s375_s10  }
 0x1c4   :  { %371 = dma.done.wait [#allocation4], 256  }
 0x1c5   :  { %372 = vsyncadd [#allocation4], 4294967040 }
 0x1c6   :  { %236 = vsyncpa [#allocation3], 1 }
 0x1c7   :  { %237 = vsyncpa [#allocation6], 1 }
 0x1c8   :  { %238 = vsyncpa [#allocation4], 1 }

</bundles_post_ra>
